<compile_context>
chip_gen: v6e
topology: v6e:2x2x1
jax: 0.10.0
libtpu: 0.0.40
codegen_flags: <defaults>
</compile_context>

<pallas_src>
import functools

import jax
import jax.numpy as jnp
from jax.experimental import pallas as pl
from jax.experimental.pallas import tpu as pltpu


def _build_feature_kernel(li_ref, p_ref, q_ref, out_ref, *, scale, n_peaks, vi1):
    # li_ref  : (TT, VI+1)  masked location indices (+padding column = -inf)
    # p_ref   : (1, K)      interleaved peak locations; +inf marks masked
    #                       peaks and the intensity slot (forces exp -> 0)
    # q_ref   : (1, K)      intensity in slot j == VI, 0 elsewhere
    # out_ref : (TT, K)     lane-dense fused output block, K = N * (VI + 1)
    li = li_ref[...]                                   # (TT, VI+1)

    # Lane-repeat li across the N peak slots (pltpu.repeat replacement):
    # write the small tile N times at static lane offsets into the output
    # block, then read the dense (TT, K) slab back.  The unaligned slice
    # stores are cheap masked vst's on a tiny tile; all the heavy elementwise
    # work below then runs fully lane-dense.
    for n in range(n_peaks):
        out_ref[:, n * vi1:(n + 1) * vi1] = li
    loc = out_ref[...]                                 # (TT, K)

    p = p_ref[...]                                     # (1, K) broadcasts over TT
    q = q_ref[...]                                     # (1, K)

    # exp(-|p - loc| * scale): masked entries hit |inf| -> exp(-inf) = 0.0,
    # exactly matching the PyTorch mask-multiplies.  Adding q injects the
    # intensity column (its slot is forced to 0 by p = +inf).
    out_ref[...] = jnp.exp(jnp.abs(p - loc) * (-scale)) + q


def _choose_time_tile(T, K, VI1, budget_bytes=6 << 20):
    """Largest time tile whose double-buffered blocks fit a conservative VMEM
    budget (safe on v5e/v6e 128 MiB and v7x 64 MiB parts)."""
    per_t = 4 * 2 * (K + VI1)            # f32, double-buffered out + li blocks
    tt = max(1, min(T, budget_bytes // per_t))
    if tt >= T:
        return T
    tt8 = (tt // 8) * 8
    if tt8 >= 8:
        # Prefer a multiple of 8 that also divides T (no boundary masking).
        for cand in range(tt8, 7, -8):
            if T % cand == 0:
                return cand
        return tt8                       # last block handled by boundary masking
    return min(T, 8)


def build_feature(location_index, peaks_location, peaks_intensity,
                  distance_scale_factor, min_inten=1e-5):
    """Pallas equivalent of Bulid_FEATURE.forward."""
    B, T, V, I = location_index.shape
    N = peaks_location.shape[1]
    assert N == peaks_intensity.shape[1]
    VI = V * I
    VI1 = VI + 1
    K = N * VI1
    f32 = jnp.float32

    # ---- JAX glue on the small (input-sized, ~1/N of output) tensors ------
    li = location_index.reshape(B, T, VI).astype(f32)
    ploc = peaks_location.astype(f32)                       # (B, N)
    pint = peaks_intensity.astype(f32)                      # (B, N)

    neg_inf = jnp.asarray(-jnp.inf, f32)
    pos_inf = jnp.asarray(jnp.inf, f32)

    # location_index with mask folded in (-inf where <= min_inten), plus one
    # sentinel column for the intensity slot.
    li_m = jnp.where(li > min_inten, li, neg_inf)           # (B, T, VI)
    li_pad = jnp.concatenate(
        [li_m, jnp.full((B, T, 1), neg_inf, f32)], axis=-1)  # (B, T, VI+1)

    # Interleaved per-batch peak rows (tiny: B x K floats each).
    ploc_m = jnp.where(ploc > min_inten, ploc, pos_inf)     # (B, N)
    p_row = jnp.concatenate(
        [jnp.broadcast_to(ploc_m[:, :, None], (B, N, VI)),
         jnp.full((B, N, 1), pos_inf, f32)], axis=-1).reshape(B, 1, K)
    q_row = jnp.concatenate(
        [jnp.zeros((B, N, VI), f32),
         pint[:, :, None]], axis=-1).reshape(B, 1, K)

    # ---- Tiling -------------------------------------------------------------
    TT = _choose_time_tile(T, K, VI1)
    num_t_blocks = -(-T // TT)
    # v7x has 2 TensorCores: make sure the parallel grid has >= 2 steps.
    if B * num_t_blocks < 2 and TT == T and T >= 16 and (T // 2) % 8 == 0:
        TT = T // 2
        num_t_blocks = 2

    kernel = functools.partial(
        _build_feature_kernel,
        scale=float(distance_scale_factor),
        n_peaks=N,
        vi1=VI1,
    )

    cost = pl.CostEstimate(
        flops=4 * B * T * K,
        transcendentals=B * T * K,
        bytes_accessed=4 * (B * T * K + B * T * VI1 + 2 * B * K),
    )

    out_flat = pl.pallas_call(
        kernel,
        out_shape=jax.ShapeDtypeStruct((B, T, K), f32),
        grid=(B, num_t_blocks),
        in_specs=[
            pl.BlockSpec((None, TT, VI1), lambda b, t: (b, t, 0)),
            pl.BlockSpec((None, 1, K), lambda b, t: (b, 0, 0)),
            pl.BlockSpec((None, 1, K), lambda b, t: (b, 0, 0)),
        ],
        out_specs=pl.BlockSpec((None, TT, K), lambda b, t: (b, t, 0)),
        compiler_params=pltpu.CompilerParams(
            dimension_semantics=("parallel", "parallel"),
            vmem_limit_bytes=32 * 1024 * 1024,
        ),
        cost_estimate=cost,
    )(li_pad, p_row, q_row)

    # Free (metadata-only) reshape back to the PyTorch output layout.
    return out_flat.reshape(B, T, N, VI1)


def _reference(location_index, peaks_location, peaks_intensity,
               distance_scale_factor, min_inten=1e-5):
    """Pure-JAX reference mirroring the PyTorch forward exactly."""
    B, T, V, I = location_index.shape
    N = peaks_location.shape[1]
    ploc = peaks_location.reshape(B, 1, N, 1).astype(jnp.float32)
    pint = peaks_intensity.reshape(B, 1, N, 1).astype(jnp.float32)
    ploc_mask = (ploc > min_inten).astype(jnp.float32)
    pint_exp = jnp.broadcast_to(pint, (B, T, N, 1))
    li = location_index.reshape(B, T, 1, V * I).astype(jnp.float32)
    li_mask = (li > min_inten).astype(jnp.float32)
    dev = jnp.abs(ploc - li)
    e = jnp.exp(-dev * distance_scale_factor) * ploc_mask * li_mask
    return jnp.concatenate([e, pint_exp], axis=3)


if __name__ == "__main__":
    key = jax.random.PRNGKey(0)
    k1, k2, k3, k4, k5 = jax.random.split(key, 5)

    B, T, V, I, N = 2, 8, 4, 2, 16
    distance_scale_factor = 100.0

    # location_index with some zero entries (to exercise location_index_mask)
    location_index = jax.random.uniform(k1, (B, T, V, I), jnp.float32, 0.0, 10.0)
    zero_mask_li = jax.random.bernoulli(k2, 0.3, (B, T, V, I))
    location_index = jnp.where(zero_mask_li, 0.0, location_index)

    # peaks_location with some zeros (to exercise peaks_location_mask)
    peaks_location = jax.random.uniform(k3, (B, N), jnp.float32, 0.0, 10.0)
    zero_mask_pl = jax.random.bernoulli(k4, 0.25, (B, N))
    peaks_location = jnp.where(zero_mask_pl, 0.0, peaks_location)

    peaks_intensity = jax.random.uniform(k5, (B, N), jnp.float32, 0.0, 1.0)

    out = build_feature(location_index, peaks_location, peaks_intensity,
                        distance_scale_factor)
    out = jax.block_until_ready(out)

    ref = _reference(location_index, peaks_location, peaks_intensity,
                     distance_scale_factor)

    assert out.shape == (B, T, N, V * I + 1), out.shape
    assert jnp.allclose(out, ref, atol=1e-6, rtol=1e-6), "mismatch vs reference"

    print("KERNEL_OK")
</pallas_src>

<mosaic_0001>
module attributes {stable_mosaic.version = 11 : i64} {
  func.func @_build_feature_kernel(%arg0: i32, %arg1: i32, %arg2: memref<1x8x9xf32, #tpu.memory_space<vmem>>, %arg3: memref<1x1x144xf32, #tpu.memory_space<vmem>>, %arg4: memref<1x1x144xf32, #tpu.memory_space<vmem>>, %arg5: memref<1x8x144xf32, #tpu.memory_space<vmem>>) attributes {dimension_semantics = [#tpu.dimension_semantics<parallel>, #tpu.dimension_semantics<parallel>], iteration_bounds = array<i64: 2, 1>, scalar_prefetch = 0 : i64, scratch_operands = 0 : i64, tpu.core_type = #tpu.core_type<tc>, window_params = [{transform_indices = @transform_0, window_bounds = array<i64: 1, 8, 9>}, {transform_indices = @transform_1, window_bounds = array<i64: 1, 1, 144>}, {transform_indices = @transform_2, window_bounds = array<i64: 1, 1, 144>}, {transform_indices = @transform_3, window_bounds = array<i64: 1, 8, 144>}]} {
    %c0 = arith.constant 0 : index
    %c0_0 = arith.constant 0 : index
    %c0_1 = arith.constant 0 : index
    %0 = vector.load %arg2[%c0, %c0_0, %c0_1] : memref<1x8x9xf32, #tpu.memory_space<vmem>>, vector<1x8x9xf32>
    %1 = vector.shape_cast %0 : vector<1x8x9xf32> to vector<8x9xf32>
    %c0_2 = arith.constant 0 : index
    %c0_3 = arith.constant 0 : index
    %c0_4 = arith.constant 0 : index
    %2 = vector.load %arg5[%c0_2, %c0_3, %c0_4] : memref<1x8x144xf32, #tpu.memory_space<vmem>>, vector<1x8x9xf32>
    %3 = vector.shape_cast %2 : vector<1x8x9xf32> to vector<8x9xf32>
    %4 = vector.shape_cast %1 : vector<8x9xf32> to vector<1x8x9xf32>
    tpu.vector_store %arg5[%c0_2, %c0_3, %c0_4], %4 {strides = array<i32>} : memref<1x8x144xf32, #tpu.memory_space<vmem>>, vector<1x8x9xf32>,
    %c0_5 = arith.constant 0 : index
    %c0_6 = arith.constant 0 : index
    %c9 = arith.constant 9 : index
    %5 = vector.load %arg5[%c0_5, %c0_6, %c9] : memref<1x8x144xf32, #tpu.memory_space<vmem>>, vector<1x8x9xf32>
    %6 = vector.shape_cast %5 : vector<1x8x9xf32> to vector<8x9xf32>
    %7 = vector.shape_cast %1 : vector<8x9xf32> to vector<1x8x9xf32>
    tpu.vector_store %arg5[%c0_5, %c0_6, %c9], %7 {strides = array<i32>} : memref<1x8x144xf32, #tpu.memory_space<vmem>>, vector<1x8x9xf32>,
    %c0_7 = arith.constant 0 : index
    %c0_8 = arith.constant 0 : index
    %c18 = arith.constant 18 : index
    %8 = vector.load %arg5[%c0_7, %c0_8, %c18] : memref<1x8x144xf32, #tpu.memory_space<vmem>>, vector<1x8x9xf32>
    %9 = vector.shape_cast %8 : vector<1x8x9xf32> to vector<8x9xf32>
    %10 = vector.shape_cast %1 : vector<8x9xf32> to vector<1x8x9xf32>
    tpu.vector_store %arg5[%c0_7, %c0_8, %c18], %10 {strides = array<i32>} : memref<1x8x144xf32, #tpu.memory_space<vmem>>, vector<1x8x9xf32>,
    %c0_9 = arith.constant 0 : index
    %c0_10 = arith.constant 0 : index
    %c27 = arith.constant 27 : index
    %11 = vector.load %arg5[%c0_9, %c0_10, %c27] : memref<1x8x144xf32, #tpu.memory_space<vmem>>, vector<1x8x9xf32>
    %12 = vector.shape_cast %11 : vector<1x8x9xf32> to vector<8x9xf32>
    %13 = vector.shape_cast %1 : vector<8x9xf32> to vector<1x8x9xf32>
    tpu.vector_store %arg5[%c0_9, %c0_10, %c27], %13 {strides = array<i32>} : memref<1x8x144xf32, #tpu.memory_space<vmem>>, vector<1x8x9xf32>,
    %c0_11 = arith.constant 0 : index
    %c0_12 = arith.constant 0 : index
    %c36 = arith.constant 36 : index
    %14 = vector.load %arg5[%c0_11, %c0_12, %c36] : memref<1x8x144xf32, #tpu.memory_space<vmem>>, vector<1x8x9xf32>
    %15 = vector.shape_cast %14 : vector<1x8x9xf32> to vector<8x9xf32>
    %16 = vector.shape_cast %1 : vector<8x9xf32> to vector<1x8x9xf32>
    tpu.vector_store %arg5[%c0_11, %c0_12, %c36], %16 {strides = array<i32>} : memref<1x8x144xf32, #tpu.memory_space<vmem>>, vector<1x8x9xf32>,
    %c0_13 = arith.constant 0 : index
    %c0_14 = arith.constant 0 : index
    %c45 = arith.constant 45 : index
    %17 = vector.load %arg5[%c0_13, %c0_14, %c45] : memref<1x8x144xf32, #tpu.memory_space<vmem>>, vector<1x8x9xf32>
    %18 = vector.shape_cast %17 : vector<1x8x9xf32> to vector<8x9xf32>
    %19 = vector.shape_cast %1 : vector<8x9xf32> to vector<1x8x9xf32>
    tpu.vector_store %arg5[%c0_13, %c0_14, %c45], %19 {strides = array<i32>} : memref<1x8x144xf32, #tpu.memory_space<vmem>>, vector<1x8x9xf32>,
    %c0_15 = arith.constant 0 : index
    %c0_16 = arith.constant 0 : index
    %c54 = arith.constant 54 : index
    %20 = vector.load %arg5[%c0_15, %c0_16, %c54] : memref<1x8x144xf32, #tpu.memory_space<vmem>>, vector<1x8x9xf32>
    %21 = vector.shape_cast %20 : vector<1x8x9xf32> to vector<8x9xf32>
    %22 = vector.shape_cast %1 : vector<8x9xf32> to vector<1x8x9xf32>
    tpu.vector_store %arg5[%c0_15, %c0_16, %c54], %22 {strides = array<i32>} : memref<1x8x144xf32, #tpu.memory_space<vmem>>, vector<1x8x9xf32>,
    %c0_17 = arith.constant 0 : index
    %c0_18 = arith.constant 0 : index
    %c63 = arith.constant 63 : index
    %23 = vector.load %arg5[%c0_17, %c0_18, %c63] : memref<1x8x144xf32, #tpu.memory_space<vmem>>, vector<1x8x9xf32>
    %24 = vector.shape_cast %23 : vector<1x8x9xf32> to vector<8x9xf32>
    %25 = vector.shape_cast %1 : vector<8x9xf32> to vector<1x8x9xf32>
    tpu.vector_store %arg5[%c0_17, %c0_18, %c63], %25 {strides = array<i32>} : memref<1x8x144xf32, #tpu.memory_space<vmem>>, vector<1x8x9xf32>,
    %c0_19 = arith.constant 0 : index
    %c0_20 = arith.constant 0 : index
    %c72 = arith.constant 72 : index
    %26 = vector.load %arg5[%c0_19, %c0_20, %c72] : memref<1x8x144xf32, #tpu.memory_space<vmem>>, vector<1x8x9xf32>
    %27 = vector.shape_cast %26 : vector<1x8x9xf32> to vector<8x9xf32>
    %28 = vector.shape_cast %1 : vector<8x9xf32> to vector<1x8x9xf32>
    tpu.vector_store %arg5[%c0_19, %c0_20, %c72], %28 {strides = array<i32>} : memref<1x8x144xf32, #tpu.memory_space<vmem>>, vector<1x8x9xf32>,
    %c0_21 = arith.constant 0 : index
    %c0_22 = arith.constant 0 : index
    %c81 = arith.constant 81 : index
    %29 = vector.load %arg5[%c0_21, %c0_22, %c81] : memref<1x8x144xf32, #tpu.memory_space<vmem>>, vector<1x8x9xf32>
    %30 = vector.shape_cast %29 : vector<1x8x9xf32> to vector<8x9xf32>
    %31 = vector.shape_cast %1 : vector<8x9xf32> to vector<1x8x9xf32>
    tpu.vector_store %arg5[%c0_21, %c0_22, %c81], %31 {strides = array<i32>} : memref<1x8x144xf32, #tpu.memory_space<vmem>>, vector<1x8x9xf32>,
    %c0_23 = arith.constant 0 : index
    %c0_24 = arith.constant 0 : index
    %c90 = arith.constant 90 : index
    %32 = vector.load %arg5[%c0_23, %c0_24, %c90] : memref<1x8x144xf32, #tpu.memory_space<vmem>>, vector<1x8x9xf32>
    %33 = vector.shape_cast %32 : vector<1x8x9xf32> to vector<8x9xf32>
    %34 = vector.shape_cast %1 : vector<8x9xf32> to vector<1x8x9xf32>
    tpu.vector_store %arg5[%c0_23, %c0_24, %c90], %34 {strides = array<i32>} : memref<1x8x144xf32, #tpu.memory_space<vmem>>, vector<1x8x9xf32>,
    %c0_25 = arith.constant 0 : index
    %c0_26 = arith.constant 0 : index
    %c99 = arith.constant 99 : index
    %35 = vector.load %arg5[%c0_25, %c0_26, %c99] : memref<1x8x144xf32, #tpu.memory_space<vmem>>, vector<1x8x9xf32>
    %36 = vector.shape_cast %35 : vector<1x8x9xf32> to vector<8x9xf32>
    %37 = vector.shape_cast %1 : vector<8x9xf32> to vector<1x8x9xf32>
    tpu.vector_store %arg5[%c0_25, %c0_26, %c99], %37 {strides = array<i32>} : memref<1x8x144xf32, #tpu.memory_space<vmem>>, vector<1x8x9xf32>,
    %c0_27 = arith.constant 0 : index
    %c0_28 = arith.constant 0 : index
    %c108 = arith.constant 108 : index
    %38 = vector.load %arg5[%c0_27, %c0_28, %c108] : memref<1x8x144xf32, #tpu.memory_space<vmem>>, vector<1x8x9xf32>
    %39 = vector.shape_cast %38 : vector<1x8x9xf32> to vector<8x9xf32>
    %40 = vector.shape_cast %1 : vector<8x9xf32> to vector<1x8x9xf32>
    tpu.vector_store %arg5[%c0_27, %c0_28, %c108], %40 {strides = array<i32>} : memref<1x8x144xf32, #tpu.memory_space<vmem>>, vector<1x8x9xf32>,
    %c0_29 = arith.constant 0 : index
    %c0_30 = arith.constant 0 : index
    %c117 = arith.constant 117 : index
    %41 = vector.load %arg5[%c0_29, %c0_30, %c117] : memref<1x8x144xf32, #tpu.memory_space<vmem>>, vector<1x8x9xf32>
    %42 = vector.shape_cast %41 : vector<1x8x9xf32> to vector<8x9xf32>
    %43 = vector.shape_cast %1 : vector<8x9xf32> to vector<1x8x9xf32>
    tpu.vector_store %arg5[%c0_29, %c0_30, %c117], %43 {strides = array<i32>} : memref<1x8x144xf32, #tpu.memory_space<vmem>>, vector<1x8x9xf32>,
    %c0_31 = arith.constant 0 : index
    %c0_32 = arith.constant 0 : index
    %c126 = arith.constant 126 : index
    %44 = vector.load %arg5[%c0_31, %c0_32, %c126] : memref<1x8x144xf32, #tpu.memory_space<vmem>>, vector<1x8x9xf32>
    %45 = vector.shape_cast %44 : vector<1x8x9xf32> to vector<8x9xf32>
    %46 = vector.shape_cast %1 : vector<8x9xf32> to vector<1x8x9xf32>
    tpu.vector_store %arg5[%c0_31, %c0_32, %c126], %46 {strides = array<i32>} : memref<1x8x144xf32, #tpu.memory_space<vmem>>, vector<1x8x9xf32>,
    %c0_33 = arith.constant 0 : index
    %c0_34 = arith.constant 0 : index
    %c135 = arith.constant 135 : index
    %47 = vector.load %arg5[%c0_33, %c0_34, %c135] : memref<1x8x144xf32, #tpu.memory_space<vmem>>, vector<1x8x9xf32>
    %48 = vector.shape_cast %47 : vector<1x8x9xf32> to vector<8x9xf32>
    %49 = vector.shape_cast %1 : vector<8x9xf32> to vector<1x8x9xf32>
    tpu.vector_store %arg5[%c0_33, %c0_34, %c135], %49 {strides = array<i32>} : memref<1x8x144xf32, #tpu.memory_space<vmem>>, vector<1x8x9xf32>,
    %c0_35 = arith.constant 0 : index
    %c0_36 = arith.constant 0 : index
    %c0_37 = arith.constant 0 : index
    %50 = vector.load %arg5[%c0_35, %c0_36, %c0_37] : memref<1x8x144xf32, #tpu.memory_space<vmem>>, vector<1x8x144xf32>
    %51 = vector.shape_cast %50 : vector<1x8x144xf32> to vector<8x144xf32>
    %c0_38 = arith.constant 0 : index
    %c0_39 = arith.constant 0 : index
    %c0_40 = arith.constant 0 : index
    %52 = vector.load %arg3[%c0_38, %c0_39, %c0_40] : memref<1x1x144xf32, #tpu.memory_space<vmem>>, vector<1x1x144xf32>
    %53 = vector.shape_cast %52 : vector<1x1x144xf32> to vector<1x144xf32>
    %c0_41 = arith.constant 0 : index
    %c0_42 = arith.constant 0 : index
    %c0_43 = arith.constant 0 : index
    %54 = vector.load %arg4[%c0_41, %c0_42, %c0_43] : memref<1x1x144xf32, #tpu.memory_space<vmem>>, vector<1x1x144xf32>
    %55 = vector.shape_cast %54 : vector<1x1x144xf32> to vector<1x144xf32>
    %56 = vector.broadcast %53 : vector<1x144xf32> to vector<8x144xf32>
    %57 = arith.subf %56, %51 : vector<8x144xf32>
    %58 = math.absf %57 : vector<8x144xf32>
    %cst = arith.constant -1.000000e+02 : f32
    %59 = vector.broadcast %cst : f32 to vector<8x144xf32>
    %60 = arith.mulf %58, %59 : vector<8x144xf32>
    %61 = math.exp %60 : vector<8x144xf32>
    %62 = vector.broadcast %55 : vector<1x144xf32> to vector<8x144xf32>
    %63 = arith.addf %61, %62 : vector<8x144xf32>
    %c0_44 = arith.constant 0 : index
    %c0_45 = arith.constant 0 : index
    %c0_46 = arith.constant 0 : index
    %64 = vector.load %arg5[%c0_44, %c0_45, %c0_46] : memref<1x8x144xf32, #tpu.memory_space<vmem>>, vector<1x8x144xf32>
    %65 = vector.shape_cast %64 : vector<1x8x144xf32> to vector<8x144xf32>
    %66 = vector.shape_cast %63 : vector<8x144xf32> to vector<1x8x144xf32>
    tpu.vector_store %arg5[%c0_44, %c0_45, %c0_46], %66 {strides = array<i32>} : memref<1x8x144xf32, #tpu.memory_space<vmem>>, vector<1x8x144xf32>,
    return
  }
  func.func @transform_0(%arg0: i32, %arg1: i32) -> (i32, i32, i32) {
    %c0_i32 = arith.constant 0 : i32
    %c0_i32_0 = arith.constant 0 : i32
    return %arg0, %arg1, %c0_i32 : i32, i32, i32
  }
  func.func @transform_1(%arg0: i32, %arg1: i32) -> (i32, i32, i32) {
    %c0_i32 = arith.constant 0 : i32
    %c0_i32_0 = arith.constant 0 : i32
    %c0_i32_1 = arith.constant 0 : i32
    return %arg0, %c0_i32, %c0_i32_0 : i32, i32, i32
  }
  func.func @transform_2(%arg0: i32, %arg1: i32) -> (i32, i32, i32) {
    %c0_i32 = arith.constant 0 : i32
    %c0_i32_0 = arith.constant 0 : i32
    %c0_i32_1 = arith.constant 0 : i32
    return %arg0, %c0_i32, %c0_i32_0 : i32, i32, i32
  }
  func.func @transform_3(%arg0: i32, %arg1: i32) -> (i32, i32, i32) {
    %c0_i32 = arith.constant 0 : i32
    %c0_i32_0 = arith.constant 0 : i32
    return %arg0, %arg1, %c0_i32 : i32, i32, i32
  }
}

</mosaic_0001>

<bundles_post_ra>
// kernel: tpu_custom_call.1
= control target key start
LH: loop header
LB: loop body
LE: loop exit
PB: predicated region body
PF: predicated region fallthrough
CT: control target
= control target key end

     0   :  { %s1086_s0 = inlined_call_operand.hbm [shape: f32[2,8,9], index: 0, kind: input, shape index: {}]   ;;  %s1087_s1 = inlined_call_operand.hbm [shape: f32[2,1,144], index: 1, kind: input, shape index: {}]   ;;  %s1088_s2 = inlined_call_operand.hbm [shape: f32[2,1,144], index: 2, kind: input, shape index: {}]   ;;  %s1089_s3 = inlined_call_operand.hbm [shape: f32[2,8,144], index: 3, kind: output, shape index: {}]  }
   0x1   :  { %1092 = sst [smem:[#allocation14_spill]] %s1087_s1 }
   0x2   :  { %1093 = sst [smem:[#allocation15_spill]] %s1088_s2 }
   0x3   :  { %8 = vsyncpa [#allocation3], 0 }
   0x4   :  { %10 = vsyncpa [#allocation3 + $0x1], 0 }
   0x5   :  { %11 = vsyncpa [#allocation6], 0 }
   0x6   :  { %13 = vsyncpa [#allocation6 + $0x1], 0 }
   0x7   :  { %14 = vsyncpa [#allocation4], 0 }
   0x8   :  { %16 = vsyncpa [#allocation4 + $0x1], 0  ;;  %s865_s12 = smov 0   ;;  %s867_s13 = smov 0  }
   0x9   :  { %s869_s14 = smov 0   ;;  %s871_s15 = smov 0  }
   0xa   :  { %s873_s16 = smov 0   ;;  %s875_s17 = smov 0  }
   0xb LB: > { %1094 = sst [smem:[#allocation12_spill]] %s820_s16  ;;  %s896_s18 = sadd.s32 4294967295, %s824_s17   ;;  %s824_s17 = sphi %s875_s17, %s22_s17   ;;  %s820_s16 = sphi %s873_s16, %s1106_s16   ;;  %s816_s15 = sphi %s871_s15, %s1105_s15   ;;  %s812_s14 = sphi %s869_s14, %s1109_s14   ;;  %s808_s13 = sphi %s867_s13, %s1108_s13   ;;  %s804_s12 = sphi %s865_s12, %s1107_s12  }
   0xc   : > { %s541_s19 = sadd.s32 4294967294, %s824_s17   ;;  %s34_s20 = sadd.s32 1, %s820_s16 }
   0xd   : > { %s43_s21 = sadd.s32 1, %s812_s14  ;;  %p36_p0 = scmp.ge.s32.totalorder %s34_s20, 2 }
   0xe   : > { %p50_p1 = scmp.ne.s32.totalorder %s812_s14, %s808_s13  ;;  %p51_p2 = scmp.eq.s32.totalorder %s824_s17, 0 }
   0xf   : > { %p56_p3 = scmp.ne.s32.totalorder %s808_s13, %s804_s12  ;;  %s1111_s20 = smov (%p36_p0, %s34_s20), 0 }
  0x10   : > { %1095 = sst [smem:[#allocation13_spill]] %s1111_s20  ;;  %p908_p4 = por %p51_p2, %p50_p1 }
  0x11   : > { %p57_p5 = scmp.eq.s32.totalorder %s896_s18, 0  ;;  %s38_s23 = ssub.s32 %s820_s16, %s1111_s20 }
  0x12   : > { %p134_p6 = scmp.eq.s32.totalorder %s896_s18, 1  ;;  %p41_p7 = scmp.eq.s32.totalorder %s38_s23, 0 }
  0x13   : > { %p916_p8 = por %p57_p5, %p56_p3  ;;  %p140_p10 = scmp.eq.s32.totalorder %s541_s19, 1 }
  0x14   : > { %p920_p9 = por %p134_p6, %p50_p1  ;;  %p587_p13 = scmp.lt.s32.totalorder %s824_s17, 2 }
  0x15   : > { %s925_s26 = scalar_select %p41_p7, %s812_s14, %s43_s21  }
  0x16   : > { %p927_p11 = por %p140_p10, %p56_p3  ;;  %s934_s28 = sand.u32 1, %s812_s14  }
  0x17   : > { %s179_s29 = sand.u32 1, %s824_s17   ;;  %s546_s30 = sshll.u32 %s934_s28, 1 }
  0x18   : > { %p940_p0 = pnand %p587_p13, %p908_p4  ;;  %s562_s5 = sshll.u32 %s820_s16, 5 }
  0x19   : > { %s1101_s1 = sld [smem:[#allocation14_spill]]  ;;  %s183_s9 = scalar_lea.vmem [#allocation5], %s546_s30 }
  0x1a   : > { %s191_s10 = sshll.u32 %s183_s9, 4  ;;  %s1102_s2 = sld [smem:[#allocation15_spill]]  ;;  %s192_s10 = int_to_ptr.vmem [resolvable:$true] %s191_s10 }
  0x1b   : > { %s955_s22 = scalar_lea.sflag [#allocation6], %s179_s29  ;;  %p658_p1 = pneg %p940_p0 }
  0x1c   : > { %s669_s23 = scalar_lea.vmem %s192_s10, 32  ;;  %s826_s6 = smov [#allocation5]  }
  0x1d   : > { %p670_p2 = scmp.ne.s32.totalorder %s192_s10, %s669_s23  ;;  %s674_s7 = sshll.u32 %s826_s6, 4  ;;  %s675_s7 = int_to_ptr.vmem [resolvable:$false] %s674_s7 }
  0x1e   : > { %s676_s9 = scalar_lea.vmem %s675_s7, 64  ;;  %p677_p5 = scmp.lt.s32.totalorder %s192_s10, %s675_s7 }
  0x1f   : > { %s189_s8 = scalar_lea.hbm %s1101_s1, %s562_s5  ;;  %p672_p3 = pnand %p670_p2, %p658_p1 }
  0x20   : > { %s953_s21 = scalar_lea.hbm %s1102_s2, %s562_s5  ;;  %p678_p6 = scmp.lt.s32.totalorder %s676_s9, %s669_s23 }
  0x21   : > { %p673_p4 = pneg %p672_p3 }
  0x22   : > { %p679_p7 = por %p678_p6, %p677_p5 }
  0x24   : > { %p680_p10 = pnand %p679_p7, %p673_p4 }
  0x26   : > { %683 = shalt.err (!%p680_p10)
}
  0x27   : > { %579 = dma.hbm_to_vmem [thread:$0]  (!%p940_p0), %s189_s8, 32, %s192_s10, %s955_s22  }
  0x28   : > { %p552_p13 = scmp.ge.s32.totalorder %s824_s17, 1  ;;  %p215_p2 = scmp.lt.s32.totalorder %s824_s17, 3 }
  0x29   : > { %s544_s5 = sshll.u32 %s934_s28, 3  ;;  %s545_s11 = sshll.u32 %s820_s16, 7 }
  0x2a   : > { %p967_p3 = pnand %p552_p13, %p215_p2  ;;  %s170_s6 = scalar_lea.hbm %s1086_s0, %s545_s11 }
  0x2b   : > { %s164_s7 = scalar_lea.vmem [#allocation2], %s544_s5  ;;  %s202_s1 = scalar_lea.vmem [#allocation7], %s546_s30 }
  0x2c   : > { %s172_s9 = sshll.u32 %s164_s7, 4  ;;  %s210_s2 = sshll.u32 %s202_s1, 4  ;;  %s173_s9 = int_to_ptr.vmem [resolvable:$true] %s172_s9  ;;  %s978_s2 = int_to_ptr.vmem [resolvable:$true] %s210_s2 }
  0x2d   : > { %s161_s8 = scalar_lea.sflag [#allocation3], %s934_s28  ;;  %s697_s10 = scalar_lea.vmem %s173_s9, 128 }
  0x2e   : > { %p698_p4 = scmp.ne.s32.totalorder %s173_s9, %s697_s10  ;;  %s827_s20 = smov [#allocation2]  }
  0x2f   : > { %s702_s16 = sshll.u32 %s827_s20, 4  ;;  %s703_s16 = int_to_ptr.vmem [resolvable:$false] %s702_s16 }
  0x30   : > { %p700_p5 = pnand %p698_p4, %p658_p1  ;;  %s704_s19 = scalar_lea.vmem %s703_s16, 256 }
  0x31   : > { %p705_p7 = scmp.lt.s32.totalorder %s173_s9, %s703_s16  ;;  %p706_p10 = scmp.lt.s32.totalorder %s704_s19, %s697_s10 }
  0x32   : > { %p701_p6 = pneg %p700_p5 }
  0x33   : > { %p707_p13 = por %p706_p10, %p705_p7 }
  0x35   : > { %p708_p2 = pnand %p707_p13, %p701_p6 }
  0x37   : > { %711 = shalt.err (!%p708_p2)
}
  0x38   : > { %576 = dma.hbm_to_vmem [thread:$0]  (!%p940_p0), %s170_s6, 128, %s173_s9, %s161_s8  }
  0x39   : > { %s725_s1 = scalar_lea.vmem %s978_s2, 32  ;;  %s828_s20 = smov [#allocation7]  }
  0x3a   : > { %p726_p12 = scmp.ne.s32.totalorder %s978_s2, %s725_s1  ;;  %s730_s28 = sshll.u32 %s828_s20, 4  ;;  %s731_s28 = int_to_ptr.vmem [resolvable:$false] %s730_s28 }
  0x3b   : > { %s732_s16 = scalar_lea.vmem %s731_s28, 64  ;;  %p733_p7 = scmp.lt.s32.totalorder %s978_s2, %s731_s28 }
  0x3c   : > { %p728_p4 = pnand %p726_p12, %p658_p1  ;;  %p734_p6 = scmp.lt.s32.totalorder %s732_s16, %s725_s1 }
  0x3e   : > { %p729_p5 = pneg %p728_p4  ;;  %p735_p10 = por %p734_p6, %p733_p7 }
  0x40   : > { %p736_p13 = pnand %p735_p10, %p729_p5 }
  0x42   : > { %739 = shalt.err (!%p736_p13)
}
  0x43   : > { %582 = dma.hbm_to_vmem [thread:$0]  (!%p940_p0), %s953_s21, 32, %s978_s2, %s955_s22  }
  0x44   : > { %219 = sbr.rel (%p967_p3) target bundleno = 266 (0x10a), region = 32  ;;  %s1000_s30 = sand.u32 (!%p967_p3), 1, %s808_s13  }
  0x45   : > { %s553_s5 = sshll.u32 (!%p967_p3), %s1000_s30, 3  ;;  %s222_s11 = scalar_lea.sflag (!%p967_p3), [#allocation3], %s1000_s30 }
  0x46   : > { %s225_s23 = scalar_lea.vmem (!%p967_p3), [#allocation2], %s553_s5 }
  0x49   : > { %791 = dma.done.wait (%p916_p8), %s222_s11, 128  }
  0x4a   : > { %793 = vsyncadd (%p916_p8), %s222_s11, 4294967168  ;;  %s230_s2 = sand.u32 1, %s896_s18   ;;  %s554_s4 = sshll.u32 %s1000_s30, 1 }
  0x4b   : > { %s231_s21 = scalar_lea.sflag [#allocation6], %s230_s2  ;;  %s1012_s22 = scalar_lea.vmem [#allocation5], %s554_s4 }
  0x4c   : > { %795 = dma.done.wait (%p916_p8), %s231_s21, 64  }
  0x4d   : > { %797 = vsyncadd (%p916_p8), %s231_s21, 4294967232  ;;  %vm277_vm0 = vcmask 72704   ;;  %v276_v0 = vld [vmem:[%s225_s23] sm:$0xff]  ;;  %s556_s29 = sshll.u32 %s1000_s30, 4  ;;  %s829_s6 = smov 9   ;;  %vm283_vm1 = vcmask 146504   ;;  %v362_v11 = vlaneseq }
  0x4e   : > { %280 = vrot.lane.b32.xlu0 %v276_v0, %s829_s6  ;;  %s830_s7 = smov 27   ;;  %s1019_s9 = scalar_lea.vmem [#allocation8], %s556_s29  ;;  %vm288_vm2 = vcmask 220304   ;;  %vm293_vm3 = vcmask 294104   ;;  %vm298_vm4 = vcmask 367904   ;;  %vm303_vm5 = vcmask 441704  }
  0x4f   : > { %290 = vrot.lane.b32.xlu1 %v276_v0, %s830_s7  ;;  %278 = vst.msk [vmem:[%s1019_s9] sm:$0xff] %vm277_vm0, %v276_v0  ;;  %s831_s18 = smov 18   ;;  %s832_s8 = smov 36   ;;  %vm308_vm6 = vcmask 515504   ;;  %vm313_vm7 = vcmask 589304   ;;  %vm318_vm8 = vcmask 663104  }
  0x50   : > { %s833_s10 = smov 45   ;;  %s834_s24 = smov 54   ;;  %vm323_vm9 = vcmask 736904   ;;  %vm328_vm10 = vcmask 810704   ;;  %vm333_vm11 = vcmask 884504   ;;  %vm338_vm12 = vcmask 958304  }
  0x51   : > { %s835_s19 = smov 63   ;;  %s836_s1 = smov 72   ;;  %vm343_vm13 = vcmask 1032104   ;;  %vm350_vm14 = vcmask 56320   ;;  %v363_v14 = vshrl.u32 %v362_v11, 7  ;;  %vm348_vm15 = vcmask 1048560  }
  0x52   : > { %285 = vrot.lane.b32.xlu0 %v276_v0, %s831_s18  ;;  %s837_s20 = smov 81   ;;  %s838_s28 = smov 90   ;;  %vm355_vm0 = vcmask 130104   ;;  %v359_v18 = vld [vmem:[%s1012_s22] sm:$0x3] }
  0x53   : > { %295 = vrot.lane.b32.xlu1 %v276_v0, %s832_s8  ;;  %s839_s16 = smov 99   ;;  %s840_s5 = smov 108   ;;  %v364_v17 = vsub.s32 0, %v363_v14  ;;  %v368_v20 = vsub.s32 1, %v363_v14 }
  0x54   : > { %s841_s11 = smov 117   ;;  %s842_s23 = smov 126  }
  0x55   : > { %s843_s2 = smov 7   ;;  %v365_v21 = vrot.slane %v359_v18, %v364_v17  ;;  %v369_v23 = vrot.slane %v359_v18, %v368_v20  ;;  %s243_s21 = scalar_lea.vmem [#allocation7], %s554_s4 }
  0x56   : > { %300 = vrot.lane.b32.xlu0 %v276_v0, %s833_s10  ;;  %v360_v33 = vld [vmem:[%s243_s21] sm:$0x3]  ;;  %s564_s22 = sshll.u32 %s816_s15, 8  ;;  %s415_s29 = sshll.u32 %s1019_s9, 4  ;;  %s416_s29 = int_to_ptr.vmem [resolvable:$true] %s415_s29 }
  0x57   : > { %305 = vrot.lane.b32.xlu1 %v276_v0, %s834_s24  ;;  %v386_v34 = vrot.slane %v360_v33, %v364_v17  ;;  %v390_v36 = vrot.slane %v360_v33, %v368_v20  ;;  %s413_s18 = scalar_lea.hbm %s1089_s3, %s564_s22  ;;  %s399_s8 = scalar_lea.sflag [#allocation4], %s1000_s30 }
  0x58   : > { %s740_s4 = scalar_lea.vmem %s416_s29, 256  ;;  %s844_s10 = smov [#allocation8]  }
  0x59   : > { %p741_p8 = scmp.ne.s32.totalorder %s416_s29, %s740_s4  ;;  %s744_s24 = sshll.u32 %s844_s10, 4  ;;  %s745_s24 = int_to_ptr.vmem [resolvable:$false] %s744_s24 }
  0x5a   : > { %310 = vrot.lane.b32.xlu0 %v276_v0, %s835_s19  ;;  %s746_s15 = scalar_lea.vmem %s745_s24, 512  ;;  %p747_p1 = scmp.lt.s32.totalorder %s416_s29, %s745_s24 }
  0x5b   : > { %315 = vrot.lane.b32.xlu1 %v276_v0, %s836_s1  ;;  %p742_p12 = pnand %p741_p8, %p920_p9  ;;  %p748_p3 = scmp.lt.s32.totalorder %s746_s15, %s740_s4 }
  0x5d   : > { %p743_p0 = pneg %p742_p12  ;;  %p749_p2 = por %p748_p3, %p747_p1 }
  0x5e   : > { %320 = vrot.lane.b32.xlu0 %v276_v0, %s837_s20 }
  0x5f   : > { %325 = vrot.lane.b32.xlu1 %v276_v0, %s838_s28  ;;  %p750_p4 = pnand %p749_p2, %p743_p0 }
  0x62   : > { %330 = vrot.lane.b32.xlu0 %v276_v0, %s839_s16 }
  0x63   : > { %335 = vrot.lane.b32.xlu1 %v276_v0, %s840_s5 }
  0x66   : > { %340 = vrot.lane.b32.xlu0 %v276_v0, %s841_s11 }
  0x67   : > { %345 = vrot.lane.b32.xlu1 %v276_v0, %s842_s23 }
  0x6a   : > { %352 = vrot.lane.b32.xlu0 %v276_v0, %s843_s2 }
  0xc0   : > { %v281_v1 = vpop.permute.xlu0 %280 }
  0xc1   : > { %v291_v2 = vpop.permute.xlu1 %290  ;;  %284 = vst.msk [vmem:[%s1019_s9] sm:$0xff] %vm283_vm1, %v281_v1  ;;  %vm396_vm1 = vcmask 130048  }
  0xc4   : > { %v286_v3 = vpop.permute.xlu0 %285 }
  0xc5   : > { %v296_v4 = vpop.permute.xlu1 %295  ;;  %289 = vst.msk [vmem:[%s1019_s9] sm:$0xff] %vm288_vm2, %v286_v3 }
  0xc6   : > { %294 = vst.msk [vmem:[%s1019_s9] sm:$0xff] %vm293_vm3, %v291_v2 }
  0xc7   : > { %299 = vst.msk [vmem:[%s1019_s9] sm:$0xff] %vm298_vm4, %v296_v4 }
  0xc8   : > { %v301_v5 = vpop.permute.xlu0 %300 }
  0xc9   : > { %v306_v6 = vpop.permute.xlu1 %305  ;;  %304 = vst.msk [vmem:[%s1019_s9] sm:$0xff] %vm303_vm5, %v301_v5 }
  0xca   : > { %309 = vst.msk [vmem:[%s1019_s9] sm:$0xff] %vm308_vm6, %v306_v6 }
  0xcc   : > { %v311_v7 = vpop.permute.xlu0 %310 }
  0xcd   : > { %v316_v8 = vpop.permute.xlu1 %315  ;;  %314 = vst.msk [vmem:[%s1019_s9] sm:$0xff] %vm313_vm7, %v311_v7 }
  0xce   : > { %319 = vst.msk [vmem:[%s1019_s9] sm:$0xff] %vm318_vm8, %v316_v8 }
  0xd0   : > { %v321_v9 = vpop.permute.xlu0 %320 }
  0xd1   : > { %v326_v10 = vpop.permute.xlu1 %325  ;;  %324 = vst.msk [vmem:[%s1019_s9] sm:$0xff] %vm323_vm9, %v321_v9 }
  0xd2   : > { %329 = vst.msk [vmem:[%s1019_s9] sm:$0xff] %vm328_vm10, %v326_v10 }
  0xd4   : > { %v331_v12 = vpop.permute.xlu0 %330 }
  0xd5   : > { %v336_v13 = vpop.permute.xlu1 %335  ;;  %334 = vst.msk [vmem:[%s1019_s9] sm:$0xff] %vm333_vm11, %v331_v12 }
  0xd6   : > { %339 = vst.msk [vmem:[%s1019_s9] sm:$0xff] %vm338_vm12, %v336_v13 }
  0xd8   : > { %v341_v15 = vpop.permute.xlu0 %340 }
  0xd9   : > { %v346_v16 = vpop.permute.xlu1 %345  ;;  %344 = vst.msk [vmem:[%s1019_s9] sm:$0xff] %vm343_vm13, %v341_v15 }
  0xda   : > { %351 = vst.msk [vmem:[%s1019_s9 + $0x8] sm:$0xff] %vm350_vm14, %v346_v16 }
  0xdb   : > { %349 = vst.msk [vmem:[%s1019_s9] sm:$0xff] %vm348_vm15, %v346_v16 }
  0xdc   : > { %v353_v19 = vpop.permute.xlu0 %352 }
  0xdd   : > { %356 = vst.msk [vmem:[%s1019_s9 + $0x8] sm:$0xff] %vm355_vm0, %v353_v19 }
  0xe2   : > { %v357_v22 = vld [vmem:[%s1019_s9] sm:$0xff] }
  0xe3   : > { %v372_v24 = vsub.f32 %v365_v21, %v357_v22 }
  0xe4   : > { %v358_v25 = vld [vmem:[%s1019_s9 + $0x8] sm:$0xff] }
  0xe5   : > { %v374_v26 = vand.u32 2147483647, %v372_v24  ;;  %v373_v27 = vsub.f32 %v369_v23, %v358_v25 }
  0xe7   : > { %v376_v28 = vmul.f32 -100.0, %v374_v26  ;;  %v375_v29 = vand.u32 2147483647, %v373_v27 }
  0xe9   : > { %v378_v30 = vmul.f32 1.442695, %v376_v28  ;;  %v377_v31 = vmul.f32 -100.0, %v375_v29 }
  0xeb   : > { %652 = vpow2.f32 %v378_v30  ;;  %v380_v32 = vmul.f32 1.442695, %v377_v31 }
  0xed   : > { %654 = vpow2.f32 %v380_v32 }
  0xf8   : > { %v653_v35 = vpop.eup %652 }
  0xf9   : > { %v393_v37 = vadd.f32 %v653_v35, %v386_v34 }
  0xfa   : > { %v655_v38 = vpop.eup %654 }
  0xfb   : > { %395 = vst [vmem:[%s1019_s9] sm:$0xff] %v393_v37  ;;  %v394_v39 = vadd.f32 %v655_v38, %v390_v36 }
  0xfd   : > { %397 = vst.msk [vmem:[%s1019_s9 + $0x8] sm:$0xff] %vm396_vm1, %v394_v39 }
  0xfe   : > { %753 = shalt.err (!%p750_p4)
}
  0xff   : > { %s754_s19 = scalar_lea.hbm %s413_s18, 256  ;;  %s758_s1 = scalar_lea.hbm %s1089_s3, 512 }
 0x100   : > { %p755_p5 = scmp.ne.s32.totalorder %s413_s18, %s754_s19  ;;  %p759_p10 = scmp.lt.s32.totalorder %s413_s18, %s1089_s3 }
 0x101   : > { %p760_p13 = scmp.lt.s32.totalorder %s758_s1, %s754_s19 }
 0x102   : > { %p756_p7 = pnand %p755_p5, %p920_p9 }
 0x103   : > { %p761_p8 = por %p760_p13, %p759_p10 }
 0x104   : > { %p757_p6 = pneg %p756_p7 }
 0x106   : > { %p762_p12 = pnand %p761_p8, %p757_p6 }
 0x108   : > { %765 = shalt.err (!%p762_p12)
}
 0x109   : > { %571 = dma.vmem_to_hbm [thread:$0]  (%p920_p9), %s416_s29, 256, %s413_s18, %s399_s8  }
 0x10a PF: > { %s427_s16 = sand.u32 1, %s804_s12   ;;  %p1104_p0 = scmp.ge.s32.totalorder %s824_s17, 2 }
 0x10b   : > { %s428_s5 = scalar_lea.sflag [#allocation4], %s427_s16 }
 0x10c   : > { %p584_p1 = pnand %p1104_p0, %p927_p11 }
 0x10e   : > { %p585_p3 = pneg %p584_p1 }
 0x110   : > { %799 = dma.done.wait (%p585_p3), %s428_s5, 256  }
 0x111   : > { %801 = vsyncadd (%p585_p3), %s428_s5, 4294967040  ;;  %s22_s17 = sadd.s32 1, %s824_s17   ;;  %s1105_s15 = sld [smem:[#allocation12_spill]] }
 0x112   : > { %p19_p2 = scmp.ge.s32.totalorder %s22_s17, 4   ;;  %s1106_s16 = sld [smem:[#allocation13_spill]] }
 0x113   : > { %s1107_s12 = smov %s808_s13  ;;  %s1108_s13 = smov %s812_s14 }
 0x114   : > { %s1109_s14 = smov %s925_s26  ;;  %21 = sbr.rel (!%p19_p2) target bundleno = 11 (0xb), region = 101 }
 0x119   :  { %433 = vsyncpa [#allocation3], 1 }
 0x11a   :  { %435 = vsyncpa [#allocation3 + $0x1], 1 }
 0x11b   :  { %436 = vsyncpa [#allocation6], 1 }
 0x11c   :  { %438 = vsyncpa [#allocation6 + $0x1], 1 }
 0x11d   :  { %439 = vsyncpa [#allocation4], 1 }
 0x11e   :  { %441 = vsyncpa [#allocation4 + $0x1], 1 }

</bundles_post_ra>
